<compile_context>
chip_gen: v5e
topology: v5e:2x2
jax: 0.10.0
libtpu: 0.0.40
codegen_flags: <defaults>
</compile_context>

<pallas_src>
import jax
import jax.numpy as jnp
from jax.experimental import pallas as pl
from jax.experimental.pallas import tpu as pltpu


_LANE = 128
_SUBLANE = 8
# VMEM byte budget for the two double-buffered x tiles.  Sized for the
# smallest-VMEM generation (v7x: 64 MiB physical) so the same tiling is also
# safe on v5e / v6e (128 MiB physical).
_X_TILE_BUDGET = 24 * 1024 * 1024
_VMEM_LIMIT = 48 * 1024 * 1024


def _round_up(x, m):
    return ((x + m - 1) // m) * m


def _affine_kernel(x_ref, wb_ref, o_ref):
    """out_row = x_tile @ W_eff + b_eff, stored lane-dense.

    x_ref : (TB, D)     batch tile (pipelined over the batch grid)
    wb_ref: (1, D + 1)  packed [W_eff^T | b_eff] row (constant block index ->
                        VMEM-resident, never re-DMA'd)
    o_ref : (1, TB)     lane-dense output row
    """
    tb, d = x_ref.shape
    wb = wb_ref[...]
    w = wb[:, :d]                      # (1, D)  == W_eff^T   (static slice)
    b = wb[:, d:]                      # (1, 1)  == b_eff     (static slice)

    prod = x_ref[...] * w              # (TB, D) VPU multiply
    if d > _LANE and d % _LANE == 0:
        # v7x: accumulate 128-lane chunks on the VALU first so only a single
        # <=128-lane XLU reduce per row remains (keeps the kernel HBM-bound).
        acc = prod[:, :_LANE]
        for c in range(1, d // _LANE):
            acc = acc + prod[:, c * _LANE:(c + 1) * _LANE]
    else:
        acc = prod
    r = jnp.sum(acc, axis=-1, keepdims=True) + b          # (TB, 1)
    # Relayout sublane->lane so the store and the output DMA are lane-dense.
    o_ref[...] = jnp.reshape(r, (1, tb))


def _choose_tile(batch, d):
    """Batch-tile size derived from a VMEM byte budget (lane-padded rows)."""
    lane_d = _round_up(d, _LANE)                 # VMEM tile is lane-padded to 128
    per_row_bytes = 4 * lane_d                   # f32
    tb = (_X_TILE_BUDGET // 2) // per_row_bytes  # rows per (double-buffered) tile
    # Keep >= 8 grid steps for large batches: amortizes pipeline ramp and lets
    # dimension_semantics=("parallel",) shard the grid across v7x's two TCs.
    tb = min(tb, max(512, pl.cdiv(batch, 8)))
    if tb >= batch:
        return _round_up(max(batch, 1), _SUBLANE)        # single block, grid == 1
    # Multi-block case: lane-dense (1, tb) output blocks need tb % 128 == 0.
    return max(_LANE, (tb // _LANE) * _LANE)


def feedforward_pallas(x, params):
    """Eval-mode forward of the 5-layer Feedforward MLP.

    x: [B, input_size] float32.  params: dict of w{i} (pre-transposed [in, out])
    and b{i} ([1, out]).
    """
    B, D = x.shape

    # ---- collapse the activation-free, eval-mode stack into one affine map ----
    w_eff = params["w1"]                       # [D, h1]
    b_eff = params["b1"]                       # [1, h1]
    for i in range(2, 6):
        w_eff = w_eff @ params[f"w{i}"]
        b_eff = b_eff @ params[f"w{i}"] + params[f"b{i}"]
    # w_eff: [D, 1], b_eff: [1, 1] -> one packed [1, D+1] parameter row (one DMA).
    wb = jnp.concatenate([w_eff.T, b_eff], axis=1).astype(jnp.float32)

    # ---- batch tiling: x/out pipelined over the grid, params VMEM-resident ----
    tb = _choose_tile(B, D)
    grid = pl.cdiv(B, tb)      # no jnp.pad of x: ragged last block's garbage rows
                               # only reach output lanes that [:B] discards.

    out_row = pl.pallas_call(
        _affine_kernel,
        out_shape=jax.ShapeDtypeStruct((1, grid * tb), jnp.float32),
        grid=(grid,),
        in_specs=[
            pl.BlockSpec((tb, D), lambda i: (i, 0)),       # x tile (double-buffered)
            pl.BlockSpec((1, D + 1), lambda i: (0, 0)),    # packed params (resident)
        ],
        out_specs=pl.BlockSpec((1, tb), lambda i: (0, i)),  # lane-dense output row
        compiler_params=pltpu.CompilerParams(
            dimension_semantics=("parallel",),              # 2 TCs on v7x
            vmem_limit_bytes=_VMEM_LIMIT,                   # v7x-safe, ample on v5e/v6e
        ),
    )(x, wb)
    return out_row.reshape(-1)[:B].reshape(B, 1)


def init_params(key, input_size, h1, h2, h3, h4):
    """Deterministic init mimicking PyTorch Linear's U(-1/sqrt(fan_in), 1/sqrt(fan_in))."""
    dims = [(input_size, h1), (h1, h2), (h2, h3), (h3, h4), (h4, 1)]
    params = {}
    for i, (fan_in, fan_out) in enumerate(dims, start=1):
        key, kw, kb = jax.random.split(key, 3)
        bound = 1.0 / jnp.sqrt(jnp.float32(fan_in))
        # stored already transposed: [in, out]
        params[f"w{i}"] = jax.random.uniform(
            kw, (fan_in, fan_out), jnp.float32, minval=-bound, maxval=bound)
        params[f"b{i}"] = jax.random.uniform(
            kb, (1, fan_out), jnp.float32, minval=-bound, maxval=bound)
    return params


def feedforward_ref(x, params):
    """Pure-JAX layer-by-layer reference (eval-mode forward)."""
    h = x
    for i in range(1, 6):
        h = h @ params[f"w{i}"] + params[f"b{i}"]
    return h


if __name__ == "__main__":
    # Small shapes consistent with the module: batch=8, input=32, hiddens 64/64/32/16.
    B, INPUT, H1, H2, H3, H4 = 8, 32, 64, 64, 32, 16
    DP = 0.2  # dropout prob — identity in eval mode

    key = jax.random.PRNGKey(0)
    key, kx = jax.random.split(key)
    x = jax.random.normal(kx, (B, INPUT), jnp.float32)
    params = init_params(key, INPUT, H1, H2, H3, H4)

    out = jax.block_until_ready(feedforward_pallas(x, params))
    ref = feedforward_ref(x, params)

    assert out.shape == (B, 1), out.shape
    assert jnp.allclose(out, ref, atol=1e-4, rtol=1e-4), (
        f"max abs err = {jnp.max(jnp.abs(out - ref))}")

    print("KERNEL_OK")
</pallas_src>

<mosaic_0001>
module attributes {stable_mosaic.version = 11 : i64} {
  func.func @_affine_kernel(%arg0: i32, %arg1: memref<8x32xf32, #tpu.memory_space<vmem>>, %arg2: memref<1x33xf32, #tpu.memory_space<vmem>>, %arg3: memref<1x8xf32, #tpu.memory_space<vmem>>) attributes {dimension_semantics = [#tpu.dimension_semantics<parallel>], iteration_bounds = array<i64: 1>, scalar_prefetch = 0 : i64, scratch_operands = 0 : i64, tpu.core_type = #tpu.core_type<tc>, window_params = [{transform_indices = @transform_0, window_bounds = array<i64: 8, 32>}, {pipeline_mode = #tpu.pipeline_mode<synchronous>, transform_indices = @transform_1, window_bounds = array<i64: 1, 33>}, {transform_indices = @transform_2, window_bounds = array<i64: 1, 8>}]} {
    %c0 = arith.constant 0 : index
    %c0_0 = arith.constant 0 : index
    %0 = vector.load %arg2[%c0, %c0_0] : memref<1x33xf32, #tpu.memory_space<vmem>>, vector<1x33xf32>
    %1 = vector.extract_strided_slice %0 {offsets = [0, 0], sizes = [1, 32], strides = [1, 1]} : vector<1x33xf32> to vector<1x32xf32>
    %2 = vector.extract_strided_slice %0 {offsets = [0, 32], sizes = [1, 1], strides = [1, 1]} : vector<1x33xf32> to vector<1x1xf32>
    %c0_1 = arith.constant 0 : index
    %c0_2 = arith.constant 0 : index
    %3 = vector.load %arg1[%c0_1, %c0_2] : memref<8x32xf32, #tpu.memory_space<vmem>>, vector<8x32xf32>
    %4 = vector.broadcast %1 : vector<1x32xf32> to vector<8x32xf32>
    %5 = arith.mulf %3, %4 : vector<8x32xf32>
    %cst = arith.constant dense<0.000000e+00> : vector<8xf32>
    %6 = vector.multi_reduction <add>, %5, %cst [1] : vector<8x32xf32> to vector<8xf32>
    %7 = vector.shape_cast %6 : vector<8xf32> to vector<8x1xf32>
    %8 = vector.broadcast %2 : vector<1x1xf32> to vector<8x1xf32>
    %9 = arith.addf %7, %8 : vector<8x1xf32>
    %10 = vector.shape_cast %9 : vector<8x1xf32> to vector<1x8xf32>
    %c0_3 = arith.constant 0 : index
    %c0_4 = arith.constant 0 : index
    %11 = vector.load %arg3[%c0_3, %c0_4] : memref<1x8xf32, #tpu.memory_space<vmem>>, vector<1x8xf32>
    tpu.vector_store %arg3[%c0_3, %c0_4], %10 {strides = array<i32>} : memref<1x8xf32, #tpu.memory_space<vmem>>, vector<1x8xf32>,
    return
  }
  func.func @transform_0(%arg0: i32) -> (i32, i32) {
    %c0_i32 = arith.constant 0 : i32
    %c0_i32_0 = arith.constant 0 : i32
    return %arg0, %c0_i32 : i32, i32
  }
  func.func @transform_1(%arg0: i32) -> (i32, i32) {
    %c0_i32 = arith.constant 0 : i32
    %c0_i32_0 = arith.constant 0 : i32
    %c0_i32_1 = arith.constant 0 : i32
    return %c0_i32, %c0_i32_0 : i32, i32
  }
  func.func @transform_2(%arg0: i32) -> (i32, i32) {
    %c0_i32 = arith.constant 0 : i32
    %c0_i32_0 = arith.constant 0 : i32
    return %c0_i32, %arg0 : i32, i32
  }
}

</mosaic_0001>

<bundles_post_ra>
// kernel: tpu_custom_call.1
= control target key start
LH: loop header
LB: loop body
LE: loop exit
PB: predicated region body
PF: predicated region fallthrough
CT: control target
= control target key end

     0   :  { %7 = vsyncpa [#allocation3], 0  ;;  %s191_s0 = inlined_call_operand.hbm [shape: f32[8,32], index: 0, kind: input, shape index: {}]   ;;  %s192_s1 = inlined_call_operand.hbm [shape: f32[1,33], index: 1, kind: input, shape index: {}]   ;;  %s193_s2 = inlined_call_operand.hbm [shape: f32[1,8], index: 2, kind: output, shape index: {}]  }
   0x1   :  { %8 = vsyncpa [#allocation6], 0 }
   0x2   :  { %9 = vsyncpa [#allocation4], 0  ;;  %s15_s11 = sshll.u32 %s191_s0, 4  ;;  %s163_s12 = smov [#allocation2]   ;;  %s16_s11 = int_to_ptr.hbm [resolvable:$true] %s15_s11 }
   0x3   :  { %s17_s13 = sshll.u32 %s163_s12, 4  ;;  %s26_s16 = sshll.u32 %s192_s1, 4  ;;  %s18_s13 = int_to_ptr.vmem [resolvable:$true] %s17_s13  ;;  %s27_s16 = int_to_ptr.hbm [resolvable:$true] %s26_s16 }
   0x4   :  { %20 = dma.hbm_to_vmem [thread:$0]  %s16_s11, 128, %s18_s13, [#allocation3]  }
   0x5   :  { %s164_s17 = smov [#allocation5]  }
   0x6   :  { %s28_s18 = sshll.u32 %s164_s17, 4  ;;  %s29_s18 = int_to_ptr.vmem [resolvable:$true] %s28_s18 }
   0x7   :  { %31 = dma.hbm_to_vmem [thread:$0]  %s27_s16, 16, %s29_s18, [#allocation6]  }
   0x8   :  { %157 = dma.done.wait [#allocation3], 128  }
   0x9   :  { %158 = vsyncadd [#allocation3], 4294967168 }
   0xa   :  { %159 = dma.done.wait [#allocation6], 16  }
   0xb   :  { %160 = vsyncadd [#allocation6], 4294967280  ;;  %v41_v0 = vld [vmem:[#allocation2] sm:$0xff]  ;;  %v84_v1 = vld [vmem:[#allocation5] ss:$0 sm:$0xff]  ;;  %vm46_vm0 = vcmask 261120   ;;  %v55_v7 = vlaneseq }
   0xc   :  { %v45_v2 = vmul.f32 %v84_v1, %v41_v0  ;;  %v165_v4 = vmov 32   ;;  %s166_s0 = smov [#allocation7]   ;;  %s68_s21 = sshll.u32 %s193_s2, 4  ;;  %vm59_vm1 = vcmask 57344   ;;  %s69_s21 = int_to_ptr.hbm [resolvable:$true] %s68_s21 }
   0xd   :  { %83 = vset.pattern.permute.xlu0 %v165_v4  ;;  %v56_v8 = vand.u32 127, %v55_v7  ;;  %s66_s1 = sshll.u32 %s166_s0, 4  ;;  %s67_s1 = int_to_ptr.vmem [resolvable:$true] %s66_s1 }
   0xe   :  { %v47_v3 = vsel %vm46_vm0, %v45_v2, 0.0 }
   0xf   :  { %48 = vadd.xlane.f32.xlu0 %v47_v3 }
  0x82   :  { %v49_v5 = vpop.xlane.xlu0 %48 }
  0x83   :  { %v50_v6 = vadd.f32 %v84_v1, %v49_v5 }
  0x85   :  { %53 = vperm.xlu0 %83, %v50_v6  }
  0xf7   :  { %v54_v9 = vpop.permute.xlu0 %53 }
  0xf8   :  { %v57_v10 = vperm.slane %v54_v9, %v56_v8 }
  0xfa   :  { %60 = vst.msk [vmem:[#allocation7] sm:$0x1] %vm59_vm1, %v57_v10 }
  0xfb   :  { %71 = dma.vmem_to_hbm [thread:$0]  %s67_s1, 16, %s69_s21, [#allocation4]  }
  0xfc   :  { %161 = dma.done.wait [#allocation4], 16  }
  0xfd   :  { %162 = vsyncadd [#allocation4], 4294967280 }
  0xfe   :  { %76 = vsyncpa [#allocation3], 1 }
  0xff   :  { %77 = vsyncpa [#allocation6], 1 }
 0x100   :  { %78 = vsyncpa [#allocation4], 1 }

</bundles_post_ra>
